<compile_context>
chip_gen: v7x
topology: tpu7x:2x2x1
jax: 0.10.0
libtpu: 0.0.40
codegen_flags: <defaults>
</compile_context>

<pallas_src>
import jax
import jax.numpy as jnp
from jax.experimental import pallas as pl
from jax.experimental.pallas import tpu as pltpu

_MIB = 1 << 20
_VMEM_BUDGET = 40 * _MIB  # fits v7x's 64 MiB physical VMEM with headroom


def _round_up(x, m):
    return ((x + m - 1) // m) * m


def _choose_tiles(B, F_pad, C_pad, x_bytes, w_bytes, out_bytes=4,
                  budget_bytes=_VMEM_BUDGET):
    """Pick (tb, tn): batch tile and class tile, VMEM-budget driven."""
    # Class tile: keep the full padded class dim unless the double-buffered
    # weight block alone would eat more than half the budget (v7x guard).
    tn = C_pad
    target_w = budget_bytes // 2
    if 2 * F_pad * tn * w_bytes > target_w:
        m = C_pad // 128
        tn = 128
        for d in range(m, 0, -1):
            if m % d == 0 and 2 * F_pad * (128 * d) * w_bytes <= target_w:
                tn = 128 * d
                break
    w_vmem = 2 * F_pad * tn * w_bytes

    # Batch tile: largest multiple of 8 whose double-buffered x/out tiles fit
    # the remaining budget; snap to a 256-multiple once large so the 256-wide
    # MXU M dim stays full on v6e/v7x.
    per_row = 2 * (F_pad * x_bytes + tn * out_bytes)  # double-buffered bytes/row
    remaining = max(budget_bytes - w_vmem, per_row * 8)
    tb_cap = min(_round_up(B, 8), 1024)
    tb = max(8, min(tb_cap, (remaining // per_row) // 8 * 8))
    if tb >= 256:
        tb = (tb // 256) * 256
    tb = min(tb, tb_cap)
    return tb, tn


def _probes_kernel(x_ref, w_ref, b_ref, o_ref):
    # x_ref: (tb, F_pad) bf16/f32, w_ref: (F_pad, tn) bf16/f32,
    # b_ref: (1, tn) f32, o_ref: (tb, tn) f32.
    # No in-kernel cast: x already ships in the MXU dtype; accumulate in f32.
    prec = (jax.lax.Precision.HIGHEST
            if x_ref.dtype == jnp.float32 else jax.lax.Precision.DEFAULT)
    acc = jnp.dot(x_ref[...], w_ref[...],
                  preferred_element_type=jnp.float32, precision=prec)
    o_ref[...] = (acc + b_ref[...]).astype(o_ref.dtype)


def fused_linear_probes(x, w, b):
    """y[p] = x[p] @ w[p] + b[p] for all probes p, in one Pallas kernel.

    x: [P, B, F_pad] bf16/f32 (zero-padded activations, F_pad % 128 == 0)
    w: [P, F_pad, C_pad]      (zero-padded, pre-transposed weights)
    b: [P, 1, C_pad] f32      (zero-padded biases)
    returns [P, B_pad, C_pad] f32  (B_pad >= B; caller slices)
    """
    P, B, F = x.shape
    Pw, Fw, C = w.shape
    assert P == Pw and F == Fw and b.shape == (P, 1, C)
    assert F % 128 == 0 and C % 128 == 0, "pad F and C to multiples of 128"

    x_bytes = x.dtype.itemsize
    w_bytes = w.dtype.itemsize
    tb, tn = _choose_tiles(B, F, C, x_bytes, w_bytes)

    B_pad = _round_up(B, tb)
    if B_pad != B:
        x = jnp.pad(x, ((0, 0), (0, B_pad - B), (0, 0)))  # zero rows: exact

    grid = (P, C // tn, B_pad // tb)  # weight block resident across batch tiles

    vmem_needed = (2 * F * tn * w_bytes          # weight, double-buffered
                   + 2 * tb * (F * x_bytes + tn * 4)  # x + out, double-buffered
                   + 2 * tn * 4)                 # bias
    vmem_limit = int(max(32 * _MIB,
                         min(56 * _MIB, (vmem_needed * 3) // 2),
                         vmem_needed + 2 * _MIB))

    cost = pl.CostEstimate(
        flops=2 * P * B_pad * F * C,
        transcendentals=0,
        bytes_accessed=(x.size * x_bytes + w.size * w_bytes
                        + b.size * 4 + P * B_pad * C * 4),
    )

    return pl.pallas_call(
        _probes_kernel,
        out_shape=jax.ShapeDtypeStruct((P, B_pad, C), jnp.float32),
        grid_spec=pltpu.PrefetchScalarGridSpec(
            num_scalar_prefetch=0,
            grid=grid,
            in_specs=[
                # probe-sliced, batch-tiled activations
                pl.BlockSpec((None, tb, F), lambda p, n, i: (p, i, 0)),
                # this probe's class-tiled weight, lane-dense in C
                pl.BlockSpec((None, F, tn), lambda p, n, i: (p, 0, n)),
                # this probe's bias row
                pl.BlockSpec((None, 1, tn), lambda p, n, i: (p, 0, n)),
            ],
            out_specs=pl.BlockSpec((None, tb, tn), lambda p, n, i: (p, i, n)),
        ),
        compiler_params=pltpu.CompilerParams(
            dimension_semantics=("parallel", "parallel", "parallel"),
            vmem_limit_bytes=vmem_limit,
        ),
        cost_estimate=cost,
    )(x, w, b)


class LinearsProbesPallas:
    """JAX/Pallas port of LinearsProbes.

    One linear probe per feature size in the MLP spec; __call__ applies probe i
    to list_outputs[i], all probes fused into one Pallas kernel.
    use_bf16=True (default) runs bf16 operands / f32 accumulation; pass
    use_bf16=False for the exact-f32 (slower) path.
    """

    def __init__(self, representation_size, mlp_spec, mlp_coeff, num_classes,
                 key, use_bf16=True):
        print("NUM CLASSES", num_classes)
        spec = f"{representation_size}-{mlp_spec}"
        f = list(map(int, spec.split("-")))
        f[-2] = int(f[-2] * mlp_coeff)
        self.feature_sizes = f
        self.num_probes = len(f)
        self.num_classes = num_classes

        # Lane-dense / MXU-friendly padded sizes.
        self.c_pad = _round_up(num_classes, 128)
        self.f_pad = _round_up(max(f), 128)
        self.compute_dtype = jnp.bfloat16 if use_bf16 else jnp.float32

        w_list, b_list = [], []
        self.raw_params = []  # unpadded f32 (w_t, bias) master params
        for num_features in f:
            key, kw, kb = jax.random.split(key, 3)
            bound = float(num_features) ** -0.5
            # PyTorch nn.Linear weight is (num_classes, num_features); store
            # the transpose (num_features, num_classes) for the kernel.
            w_t = jax.random.uniform(
                kw, (num_features, num_classes), jnp.float32, -bound, bound)
            bias = jax.random.uniform(
                kb, (1, num_classes), jnp.float32, -bound, bound)
            self.raw_params.append((w_t, bias))

            w_pad = jnp.zeros((self.f_pad, self.c_pad), jnp.float32)
            w_pad = w_pad.at[:num_features, :num_classes].set(w_t)
            b_pad = jnp.zeros((1, self.c_pad), jnp.float32)
            b_pad = b_pad.at[:, :num_classes].set(bias)
            w_list.append(w_pad.astype(self.compute_dtype))
            b_list.append(b_pad)

        self.w_stacked = jnp.stack(w_list)   # [P, F_pad, C_pad] bf16/f32
        self.b_stacked = jnp.stack(b_list)   # [P, 1, C_pad]     f32

    def __call__(self, list_outputs, binary=False):
        # TODO(synk): `binary` flag is unused in the reference forward as well.
        assert len(list_outputs) == self.num_probes
        B = list_outputs[0].shape[0]

        # Layout plumbing (ideally jit-fused with the producer of list_outputs):
        # cast to the compute dtype, zero-pad features to F_pad, stack on the
        # probe axis.
        x_list = []
        for x, nf in zip(list_outputs, self.feature_sizes):
            x = x.astype(self.compute_dtype)  # bf16: halves x DMA + VMEM
            x_list.append(jnp.pad(x, ((0, 0), (0, self.f_pad - nf))))
        x_stacked = jnp.stack(x_list)         # [P, B, F_pad]

        y = fused_linear_probes(x_stacked, self.w_stacked, self.b_stacked)
        # ONE narrowing slice on the stacked result, then split per probe.
        y = y[:, :B, :self.num_classes]
        return [y[i] for i in range(self.num_probes)]


if __name__ == "__main__":
    key = jax.random.PRNGKey(0)

    # Small synthetic config: representation_size=32, mlp spec "64-16",
    # mlp_coeff=1.0 -> feature sizes [32, 64, 16]; num_classes=10.
    representation_size = 32
    mlp_spec = "64-16"
    mlp_coeff = 1.0
    num_classes = 10

    # --- default bf16 fast path, batch = 8 ---
    key, k_model = jax.random.split(key)
    probes = LinearsProbesPallas(
        representation_size, mlp_spec, mlp_coeff, num_classes, k_model,
        use_bf16=True)

    batch = 8
    list_outputs = []
    for nf in probes.feature_sizes:
        key, kx = jax.random.split(key)
        list_outputs.append(jax.random.normal(kx, (batch, nf), jnp.float32))

    outs = [jax.block_until_ready(o) for o in probes(list_outputs)]
    for x, (w_t, bias), y in zip(list_outputs, probes.raw_params, outs):
        assert y.shape == (batch, num_classes)
        # Tight check against a plain-JAX mirror of the kernel numerics
        # (bf16 operands, f32 accumulation, f32 bias add).
        ref_mirror = jnp.dot(x.astype(jnp.bfloat16), w_t.astype(jnp.bfloat16),
                             preferred_element_type=jnp.float32) + bias
        assert jnp.max(jnp.abs(y - ref_mirror)) < 1e-4
        # Loose sanity check against pure-f32 PyTorch-equivalent math.
        ref_f32 = x @ w_t + bias
        assert jnp.max(jnp.abs(y - ref_f32)) < 1e-1

    # --- documented f32 opt-out path; batch = 12 exercises batch padding ---
    key, k_model2 = jax.random.split(key)
    probes_f32 = LinearsProbesPallas(
        representation_size, mlp_spec, mlp_coeff, num_classes, k_model2,
        use_bf16=False)

    batch2 = 12
    list_outputs2 = []
    for nf in probes_f32.feature_sizes:
        key, kx = jax.random.split(key)
        list_outputs2.append(jax.random.normal(kx, (batch2, nf), jnp.float32))

    outs2 = [jax.block_until_ready(o) for o in probes_f32(list_outputs2)]
    for x, (w_t, bias), y in zip(list_outputs2, probes_f32.raw_params, outs2):
        assert y.shape == (batch2, num_classes)
        ref_f32 = x @ w_t + bias
        assert jnp.max(jnp.abs(y - ref_f32)) < 1e-2

    print("KERNEL_OK")
</pallas_src>

<mosaic_0001>
module attributes {stable_mosaic.version = 11 : i64} {
  func.func @_probes_kernel(%arg0: i32, %arg1: i32, %arg2: i32, %arg3: memref<1x8x128xbf16, #tpu.memory_space<vmem>>, %arg4: memref<1x128x128xbf16, #tpu.memory_space<vmem>>, %arg5: memref<1x1x128xf32, #tpu.memory_space<vmem>>, %arg6: memref<1x8x128xf32, #tpu.memory_space<vmem>>) attributes {dimension_semantics = [#tpu.dimension_semantics<parallel>, #tpu.dimension_semantics<parallel>, #tpu.dimension_semantics<parallel>], iteration_bounds = array<i64: 3, 1, 1>, scalar_prefetch = 0 : i64, scratch_operands = 0 : i64, tpu.core_type = #tpu.core_type<tc>, window_params = [{transform_indices = @transform_0, window_bounds = array<i64: 1, 8, 128>}, {transform_indices = @transform_1, window_bounds = array<i64: 1, 128, 128>}, {transform_indices = @transform_2, window_bounds = array<i64: 1, 1, 128>}, {transform_indices = @transform_3, window_bounds = array<i64: 1, 8, 128>}]} {
    %c0 = arith.constant 0 : index
    %c0_0 = arith.constant 0 : index
    %c0_1 = arith.constant 0 : index
    %0 = vector.load %arg3[%c0, %c0_0, %c0_1] : memref<1x8x128xbf16, #tpu.memory_space<vmem>>, vector<1x8x128xbf16>
    %1 = vector.shape_cast %0 : vector<1x8x128xbf16> to vector<8x128xbf16>
    %c0_2 = arith.constant 0 : index
    %c0_3 = arith.constant 0 : index
    %c0_4 = arith.constant 0 : index
    %2 = vector.load %arg4[%c0_2, %c0_3, %c0_4] : memref<1x128x128xbf16, #tpu.memory_space<vmem>>, vector<1x128x128xbf16>
    %3 = vector.shape_cast %2 : vector<1x128x128xbf16> to vector<128x128xbf16>
    %cst = arith.constant dense<0.000000e+00> : vector<8x128xf32>
    %4 = tpu.matmul %1, %3, %cst {dimension_numbers = #tpu.dot_dimension_numbers<[1], [0], [0], [1], [0, 0, 1, 1], [], []>} : vector<8x128xbf16>, vector<128x128xbf16>, vector<8x128xf32> -> vector<8x128xf32>
    %c0_5 = arith.constant 0 : index
    %c0_6 = arith.constant 0 : index
    %c0_7 = arith.constant 0 : index
    %5 = vector.load %arg5[%c0_5, %c0_6, %c0_7] : memref<1x1x128xf32, #tpu.memory_space<vmem>>, vector<1x1x128xf32>
    %6 = vector.shape_cast %5 : vector<1x1x128xf32> to vector<1x128xf32>
    %7 = vector.broadcast %6 : vector<1x128xf32> to vector<8x128xf32>
    %8 = arith.addf %4, %7 : vector<8x128xf32>
    %c0_8 = arith.constant 0 : index
    %c0_9 = arith.constant 0 : index
    %c0_10 = arith.constant 0 : index
    %9 = vector.load %arg6[%c0_8, %c0_9, %c0_10] : memref<1x8x128xf32, #tpu.memory_space<vmem>>, vector<1x8x128xf32>
    %10 = vector.shape_cast %9 : vector<1x8x128xf32> to vector<8x128xf32>
    %11 = vector.shape_cast %8 : vector<8x128xf32> to vector<1x8x128xf32>
    tpu.vector_store %arg6[%c0_8, %c0_9, %c0_10], %11 {strides = array<i32>} : memref<1x8x128xf32, #tpu.memory_space<vmem>>, vector<1x8x128xf32>,
    return
  }
  func.func @transform_0(%arg0: i32, %arg1: i32, %arg2: i32) -> (i32, i32, i32) {
    %c0_i32 = arith.constant 0 : i32
    %c0_i32_0 = arith.constant 0 : i32
    return %arg0, %arg2, %c0_i32 : i32, i32, i32
  }
  func.func @transform_1(%arg0: i32, %arg1: i32, %arg2: i32) -> (i32, i32, i32) {
    %c0_i32 = arith.constant 0 : i32
    %c0_i32_0 = arith.constant 0 : i32
    return %arg0, %c0_i32, %arg1 : i32, i32, i32
  }
  func.func @transform_2(%arg0: i32, %arg1: i32, %arg2: i32) -> (i32, i32, i32) {
    %c0_i32 = arith.constant 0 : i32
    %c0_i32_0 = arith.constant 0 : i32
    return %arg0, %c0_i32, %arg1 : i32, i32, i32
  }
  func.func @transform_3(%arg0: i32, %arg1: i32, %arg2: i32) -> (i32, i32, i32) {
    %c0_i32 = arith.constant 0 : i32
    return %arg0, %arg2, %arg1 : i32, i32, i32
  }
}

</mosaic_0001>

<bundles_post_ra>
// kernel: tpu_custom_call.1
= control target key start
LH: loop header
LB: loop body
LE: loop exit
PB: predicated region body
PF: predicated region fallthrough
CT: control target
= control target key end

     0   :  { %8 = vsyncpa [#allocation3], 0  ;;  %s1071_s0 = inlined_call_operand.hbm [shape: bf16[3,8,128], index: 0, kind: input, shape index: {}]   ;;  %s1072_s1 = inlined_call_operand.hbm [shape: bf16[3,128,128], index: 1, kind: input, shape index: {}]   ;;  %s1073_s2 = inlined_call_operand.vmem [shape: f32[3,1,128], index: 2, kind: input, shape index: {}]   ;;  %s1074_s3 = inlined_call_operand.hbm [shape: f32[3,8,128], index: 3, kind: output, shape index: {}]  }
   0x1   :  { %10 = vsyncpa [#allocation3 + $0x1], 0 }
   0x2   :  { %11 = vsyncpa [#allocation6], 0 }
   0x3   :  { %13 = vsyncpa [#allocation6 + $0x1], 0 }
   0x4   :  { %14 = vsyncpa [#allocation4], 0 }
   0x5   :  { %16 = vsyncpa [#allocation4 + $0x1], 0  ;;  %s841_s12 = smov 0   ;;  %s843_s13 = smov 0  }
   0x6   :  { %s845_s14 = smov 0   ;;  %s847_s15 = smov 0  }
   0x7   :  { %s849_s16 = smov 0   ;;  %s851_s17 = smov 0  }
   0x8 LB: > { %s531_s18 = sadd.s32 4294967295, %s812_s17   ;;  %s532_s19 = sadd.s32 4294967294, %s812_s17   ;;  %s812_s17 = sphi %s851_s17, %s22_s17   ;;  %s808_s16 = sphi %s849_s16, %s1092_s16   ;;  %s804_s15 = sphi %s847_s15, %s1091_s15   ;;  %s800_s14 = sphi %s845_s14, %s1090_s14   ;;  %s796_s13 = sphi %s843_s13, %s1089_s13   ;;  %s792_s12 = sphi %s841_s12, %s1088_s12  }
   0x9   : > { %s41_s20 = sadd.s32 1, %s808_s16  ;;  %s50_s21 = sadd.s32 1, %s800_s14 }
   0xa   : > { %p43_p0 = scmp.ge.s32.totalorder %s41_s20, 3  ;;  %p57_p1 = scmp.ne.s32.totalorder %s800_s14, %s796_s13 }
   0xb   : > { %p58_p2 = scmp.eq.s32.totalorder %s812_s17, 0  ;;  %p63_p3 = scmp.ne.s32.totalorder %s796_s13, %s792_s12 }
   0xc   : > { %s1094_s20 = smov (%p43_p0, %s41_s20), 0  ;;  %p64_p5 = scmp.eq.s32.totalorder %s531_s18, 0 }
   0xd   : > { %p882_p4 = por %p58_p2, %p57_p1  ;;  %s45_s23 = ssub.s32 %s808_s16, %s1094_s20 }
   0xe   : > { %p147_p6 = scmp.eq.s32.totalorder %s531_s18, 2  ;;  %p48_p7 = scmp.eq.s32.totalorder %s45_s23, 0 }
   0xf   : > { %p888_p8 = por %p64_p5, %p63_p3  ;;  %p153_p10 = scmp.eq.s32.totalorder %s532_s19, 2 }
  0x10   : > { %p892_p9 = por %p147_p6, %p57_p1  ;;  %p604_p12 = scmp.lt.s32.totalorder %s812_s17, 3 }
  0x11   : > { %s1078_s24 = scalar_select %p888_p8, 1, 0 }
  0x12   : > { %s1079_s25 = scalar_select %p892_p9, 1, 0 }
  0x13   : > { %s897_s26 = scalar_select %p48_p7, %s800_s14, %s50_s21  }
  0x14   : > { %p899_p11 = por %p153_p10, %p63_p3  ;;  %s905_s28 = sand.u32 1, %s800_s14  }
  0x15   : > { %s535_s29 = sshll.u32 %s905_s28, 2  ;;  %s536_s30 = sshll.u32 %s808_s16, 6 }
  0x16   : > { %s1080_s27 = scalar_select %p899_p11, 1, 0 }
  0x17   : > { %s912_s6 = scalar_lea.hbm %s1071_s0, %s536_s30  ;;  %s177_s7 = scalar_lea.vmem [#allocation2], %s535_s29 }
  0x18   : > { %s185_s8 = sshll.u32 %s177_s7, 4  ;;  %p918_p13 = pnand %p604_p12, %p882_p4  ;;  %s914_s8 = int_to_ptr.vmem [resolvable:$true] %s185_s8 }
  0x19   : > { %s174_s10 = scalar_lea.sflag [#allocation3], %s905_s28  ;;  %s666_s11 = scalar_lea.hbm %s912_s6, 64 }
  0x1a   : > { %p667_p2 = scmp.ne.s32.totalorder %s912_s6, %s666_s11  ;;  %p668_p3 = pneg %p918_p13 }
  0x1b   : > { %s671_s21 = scalar_lea.hbm %s1071_s0, 192  ;;  %p672_p4 = scmp.lt.u32.totalorder %s912_s6, %s1071_s0 }
  0x1c   : > { %p669_p5 = pnand %p668_p3, %p667_p2  ;;  %p673_p7 = scmp.lt.u32.totalorder %s671_s21, %s666_s11 }
  0x1d   : > { %p675_p12 = scmp.lt.u32.totalorder %s666_s11, %s912_s6 }
  0x1e   : > { %p670_p6 = pneg %p669_p5  ;;  %p674_p10 = por %p673_p7, %p672_p4 }
  0x20   : > { %p676_p0 = por %p675_p12, %p674_p10 }
  0x22   : > { %p677_p1 = pnand %p676_p0, %p670_p6 }
  0x24   : > { %680 = shalt.err (!%p677_p1)
}
  0x25   : > { %s681_s29 = scalar_lea.vmem %s914_s8, 64  ;;  %s814_s30 = smov [#allocation2]  }
  0x26   : > { %p682_p2 = scmp.ne.s32.totalorder %s914_s8, %s681_s29  ;;  %s686_s4 = sshll.u32 %s814_s30, 4  ;;  %s687_s4 = int_to_ptr.vmem [resolvable:$false] %s686_s4 }
  0x27   : > { %s688_s5 = scalar_lea.vmem %s687_s4, 128  ;;  %p689_p9 = scmp.lt.s32.totalorder %s914_s8, %s687_s4 }
  0x28   : > { %p684_p5 = pnand %p682_p2, %p668_p3  ;;  %p690_p4 = scmp.lt.s32.totalorder %s688_s5, %s681_s29 }
  0x2a   : > { %p685_p11 = pneg %p684_p5  ;;  %p691_p7 = por %p690_p4, %p689_p9 }
  0x2c   : > { %p692_p10 = pnand %p691_p7, %p685_p11 }
  0x2e   : > { %695 = shalt.err (!%p692_p10)
}
  0x2f   : > { %596 = dma.hbm_to_vmem [thread:$0]  (!%p918_p13), %s912_s6, 64, %s914_s8, %s174_s10  }
  0x30   : > { %p1082_p0 = scmp.lt.s32.totalorder %s812_s17, 4  ;;  %p1083_p1 = scmp.ge.s32.totalorder %s812_s17, 1 }
  0x31   : > { %s537_s11 = sshll.u32 %s905_s28, 6  ;;  %s557_s18 = sshll.u32 %s808_s16, 10 }
  0x32   : > { %p954_p6 = pnand %p1083_p1, %p1082_p0  ;;  %s963_s22 = scalar_lea.hbm %s1072_s1, %s557_s18 }
  0x33   : > { %s196_s23 = scalar_lea.vmem [#allocation5], %s537_s11  ;;  %s193_s6 = scalar_lea.sflag [#allocation6], %s905_s28 }
  0x34   : > { %s204_s29 = sshll.u32 %s196_s23, 4  ;;  %s696_s8 = scalar_lea.hbm %s963_s22, 1024  ;;  %s965_s29 = int_to_ptr.vmem [resolvable:$true] %s204_s29 }
  0x35   : > { %p697_p9 = scmp.ne.s32.totalorder %s963_s22, %s696_s8  ;;  %s701_s4 = scalar_lea.hbm %s1072_s1, 3072 }
  0x36   : > { %p702_p2 = scmp.lt.u32.totalorder %s963_s22, %s1072_s1  ;;  %p703_p5 = scmp.lt.u32.totalorder %s701_s4, %s696_s8 }
  0x37   : > { %p699_p11 = pnand %p697_p9, %p668_p3  ;;  %p705_p7 = scmp.lt.u32.totalorder %s696_s8, %s963_s22 }
  0x38   : > { %p704_p4 = por %p703_p5, %p702_p2 }
  0x39   : > { %p700_p12 = pneg %p699_p11 }
  0x3a   : > { %p706_p10 = por %p705_p7, %p704_p4 }
  0x3c   : > { %p707_p0 = pnand %p706_p10, %p700_p12 }
  0x3e   : > { %710 = shalt.err (!%p707_p0)
}
  0x3f   : > { %s711_s11 = scalar_lea.vmem %s965_s29, 1024  ;;  %s815_s19 = smov [#allocation5]  }
  0x40   : > { %p712_p1 = scmp.ne.s32.totalorder %s965_s29, %s711_s11  ;;  %s716_s21 = sshll.u32 %s815_s19, 4  ;;  %s717_s21 = int_to_ptr.vmem [resolvable:$false] %s716_s21 }
  0x41   : > { %s718_s23 = scalar_lea.vmem %s717_s21, 2048  ;;  %p719_p8 = scmp.lt.s32.totalorder %s965_s29, %s717_s21 }
  0x42   : > { %p714_p9 = pnand %p712_p1, %p668_p3  ;;  %p720_p2 = scmp.lt.s32.totalorder %s718_s23, %s711_s11 }
  0x44   : > { %p715_p11 = pneg %p714_p9  ;;  %p721_p5 = por %p720_p2, %p719_p8 }
  0x46   : > { %p722_p4 = pnand %p721_p5, %p715_p11 }
  0x48   : > { %725 = shalt.err (!%p722_p4)
}
  0x49   : > { %s816_s8 = smov 64   ;;  %s817_s10 = smov 4  }
  0x4a   : > { %599 = dma.hbm_to_vmem [thread:$0]  (!%p918_p13), %s963_s22, 1024, %s965_s29, %s193_s6, %s816_s8, %s816_s8, %s817_s10  }
  0x4b   : > { %225 = sbr.rel (%p954_p6) target bundleno = 347 (0x15b), region = 32  ;;  %s996_s30 = sand.u32 (!%p954_p6), 1, %s796_s13  }
  0x4c   : > { %s541_s4 = sshll.u32 (!%p954_p6), %s996_s30, 2  ;;  %s228_s5 = scalar_lea.sflag (!%p954_p6), [#allocation3], %s996_s30 }
  0x4d   : > { %s1000_s18 = scalar_lea.vmem (!%p954_p6), [#allocation2], %s541_s4  ;;  %p1085_p8 = scmp.ne.s32.totalorder (!%p954_p6), %s1078_s24, 0 }
  0x52   : > { %779 = dma.done.wait (%p1085_p8), %s228_s5, 64  }
  0x53   : > { %781 = vsyncadd (%p1085_p8), %s228_s5, 4294967232  ;;  %s542_s28 = sshll.u32 %s996_s30, 6  ;;  %s237_s9 = scalar_lea.sflag [#allocation6], %s996_s30 }
  0x54   : > { %s240_s7 = scalar_lea.vmem [#allocation5], %s542_s28 }
  0x55   : > { %783 = dma.done.wait (%p1085_p8), %s237_s9, 1024  }
  0x56   : > { %785 = vsyncadd (%p1085_p8), %s237_s9, 4294966272  ;;  %v818_v0 = vmov 0.0   ;;  %vm819_vm0 = vmmov 0   ;;  %v658_v1 = vld [vmem:[%s240_s7] sm:$0xff]   ;;  %v659_v2 = vld [vmem:[%s240_s7 + $0x8] sm:$0xff]   ;;  %p274_p13 = scmp.lt.s32.totalorder %s804_s15, 2 }
  0x57   : > { %567 = vmatprep.subr.bf16.mxu0 %v818_v0  ;;  %583 = vmatprep.mubr.msk.bf16.mxu0 %vm819_vm0, %v818_v0  ;;  %v660_v3 = vld [vmem:[%s240_s7 + $0x10] sm:$0xff]   ;;  %v661_v4 = vld [vmem:[%s240_s7 + $0x18] sm:$0xff]   ;;  %v662_v5 = vld [vmem:[%s240_s7 + $0x20] sm:$0xff]   ;;  %s543_s22 = sshll.u32 %s996_s30, 3  ;;  %s554_s19 = sshll.u32 %s804_s15, 7 }
  0x58   : > { %568 = vmatpush3.bf16.msra.mxu0 %v658_v1  ;;  %v663_v6 = vld [vmem:[%s240_s7 + $0x28] sm:$0xff]   ;;  %v664_v7 = vld [vmem:[%s240_s7 + $0x30] sm:$0xff]   ;;  %v665_v8 = vld [vmem:[%s240_s7 + $0x38] sm:$0xff]   ;;  %s275_s24 = scalar_select %p274_p13, %s804_s15, 2 }
  0x59   : > { %569 = vmatprep.subr.bf16.mxu0 %v818_v0  ;;  %v281_v9 = vld [vmem:[%s1000_s18] sm:$0xf]  ;;  %s273_s21 = scalar_lea.vmem [#allocation7], %s543_s22  ;;  %s1023_s4 = scalar_lea.hbm %s1074_s3, %s554_s19 }
  0x5a   : > { %s279_s11 = scalar_lea.vmem %s1073_s2, %s275_s24  ;;  %s410_s23 = sshll.u32 %s273_s21, 4  ;;  %s1025_s23 = int_to_ptr.vmem [resolvable:$true] %s410_s23 }
  0x5b   : > { %v544_v10 = vld [vmem:[%s279_s11] ss:$0 sm:$0xff]  ;;  %s395_s5 = scalar_lea.sflag [#allocation4], %s996_s30  ;;  %s726_s15 = scalar_lea.vmem %s1025_s23, 128 }
  0x5c   : > { %570 = vmatpush3.bf16.msra.mxu0 %v659_v2  ;;  %p727_p3 = scmp.ne.s32.totalorder %s1025_s23, %s726_s15  ;;  %p1086_p6 = scmp.ne.s32.totalorder %s1079_s25, 0 }
  0x5d   : > { %571 = vmatprep.subr.bf16.mxu0 %v818_v0  ;;  %s820_s18 = smov [#allocation7]  }
  0x5e   : > { %p728_p12 = pnand %p727_p3, %p1086_p6  ;;  %s730_s28 = sshll.u32 %s820_s18, 4  ;;  %s731_s28 = int_to_ptr.vmem [resolvable:$false] %s730_s28 }
  0x5f   : > { %s732_s9 = scalar_lea.vmem %s731_s28, 256  ;;  %p733_p10 = scmp.lt.s32.totalorder %s1025_s23, %s731_s28 }
  0x60   : > { %572 = vmatpush3.bf16.msra.mxu0 %v660_v3  ;;  %p729_p7 = pneg %p728_p12  ;;  %p734_p0 = scmp.lt.s32.totalorder %s732_s9, %s726_s15 }
  0x61   : > { %573 = vmatprep.subr.bf16.mxu0 %v818_v0 }
  0x62   : > { %p735_p1 = por %p734_p0, %p733_p10 }
  0x64   : > { %574 = vmatpush3.bf16.msra.mxu0 %v661_v4  ;;  %p736_p9 = pnand %p735_p1, %p729_p7 }
  0x65   : > { %575 = vmatprep.subr.bf16.mxu0 %v818_v0 }
  0x68   : > { %576 = vmatpush3.bf16.msra.mxu0 %v662_v5 }
  0x69   : > { %577 = vmatprep.subr.bf16.mxu0 %v818_v0 }
  0x6c   : > { %578 = vmatpush3.bf16.msra.mxu0 %v663_v6 }
  0x6d   : > { %579 = vmatprep.subr.bf16.mxu0 %v818_v0 }
  0x70   : > { %580 = vmatpush3.bf16.msra.mxu0 %v664_v7 }
  0x71   : > { %581 = vmatprep.subr.bf16.mxu0 %v818_v0 }
  0x74   : > { %582 = vmatpush3.bf16.msra.mxu0 %v665_v8 }
  0x77   : > { %584 = vmatmul.mubr.bf16.vlgmr.msra.gmra.mrb[0].mxu0 %v281_v9 }
 0x14a   : > { %v387_v11 = vpop.f32.mrb[0].mxu0 }
 0x14b   : > { %v388_v12 = vadd.f32 %v544_v10, %v387_v11  ;;  %v585_v13 = vpop.f32.mrb[1].mxu0 }
 0x14c   : > { %v390_v14 = vpop.f32.mrb[2].mxu0 }
 0x14d   : > { %393 = vst [vmem:[%s273_s21] sm:$0xff] %v388_v12  ;;  %v586_v15 = vpop.f32.mrb[3].mxu0 }
 0x14e   : > { %739 = shalt.err (!%p736_p9)
}
 0x14f   : > { %s740_s30 = scalar_lea.hbm %s1023_s4, 128  ;;  %s744_s22 = scalar_lea.hbm %s1074_s3, 384 }
 0x150   : > { %p741_p11 = scmp.ne.s32.totalorder %s1023_s4, %s740_s30  ;;  %p745_p4 = scmp.lt.u32.totalorder %s1023_s4, %s1074_s3 }
 0x151   : > { %p746_p8 = scmp.lt.u32.totalorder %s744_s22, %s740_s30  ;;  %p748_p3 = scmp.lt.u32.totalorder %s740_s30, %s1023_s4 }
 0x152   : > { %p742_p2 = pnand %p741_p11, %p1086_p6 }
 0x153   : > { %p747_p13 = por %p746_p8, %p745_p4 }
 0x154   : > { %p743_p5 = pneg %p742_p2 }
 0x155   : > { %p749_p12 = por %p748_p3, %p747_p13 }
 0x157   : > { %p750_p7 = pnand %p749_p12, %p743_p5 }
 0x159   : > { %753 = shalt.err (!%p750_p7)
}
 0x15a   : > { %591 = dma.vmem_to_hbm [thread:$0]  (%p1086_p6), %s1025_s23, 128, %s1023_s4, %s395_s5  }
 0x15b PF: > { %p605_p10 = scmp.ge.s32.totalorder %s812_s17, 2  ;;  %s422_s11 = sand.u32 1, %s792_s12  }
 0x15c   : > { %p1087_p0 = scmp.ne.s32.totalorder %s1080_s27, 0  ;;  %s423_s19 = scalar_lea.sflag [#allocation4], %s422_s11 }
 0x15e   : > { %p601_p1 = pnand %p605_p10, %p1087_p0 }
 0x160   : > { %787 = dma.done.wait (!%p601_p1), %s423_s19, 128  }
 0x161   : > { %789 = vsyncadd (!%p601_p1), %s423_s19, 4294967168  ;;  %s22_s17 = sadd.s32 1, %s812_s17   ;;  %s1088_s12 = smov %s796_s13 }
 0x162   : > { %p19_p9 = scmp.ge.s32.totalorder %s22_s17, 5   ;;  %s1089_s13 = smov %s800_s14 }
 0x163   : > { %s1090_s14 = smov %s897_s26  ;;  %s1091_s15 = smov %s808_s16 }
 0x164   : > { %s1092_s16 = smov %s1094_s20  ;;  %21 = sbr.rel (!%p19_p9) target bundleno = 8 (0x8), region = 93 }
 0x16b   :  { %428 = vsyncpa [#allocation3], 1 }
 0x16c   :  { %430 = vsyncpa [#allocation3 + $0x1], 1 }
 0x16d   :  { %431 = vsyncpa [#allocation6], 1 }
 0x16e   :  { %433 = vsyncpa [#allocation6 + $0x1], 1 }
 0x16f   :  { %434 = vsyncpa [#allocation4], 1 }
 0x170   :  { %436 = vsyncpa [#allocation4 + $0x1], 1 }

</bundles_post_ra>
